<compile_context>
chip_gen: v7x
topology: tpu7x:2x2x1
jax: 0.10.0
libtpu: 0.0.40
codegen_flags: <defaults>
</compile_context>

<pallas_src>
import functools

import jax
import jax.numpy as jnp
from jax.experimental import pallas as pl
from jax.experimental.pallas import tpu as pltpu

_LANES = 128
_TARGET_TILE_BYTES = 4 * 1024 * 1024     # ~86% HBM roofline plateau; fits all gens
_VMEM_LIMIT_BYTES = 32 * 1024 * 1024     # 2 inputs x 2 buffers x 4 MiB + headroom


def _cdiv(a, b):
    return (a + b - 1) // b


def _num_tensorcores_per_chip():
    # 2 TCs per chip only on v7x; v5e/v6e are single-TC. Defensive fallback to 1.
    try:
        kind = jax.devices()[0].device_kind.lower()
    except Exception:
        return 1
    return 2 if ("v7" in kind or "7x" in kind) else 1


def _depth_grad_sum_kernel(pred_ref, gt_ref, acc_ref, *, block_rows, inner,
                           valid_rows, needs_mask):
    """Accumulate sum(log(|pred - gt| + 1)) of this tile into an (8,128) slab."""
    o = pl.program_id(0)
    i = pl.program_id(1)

    @pl.when(i == 0)
    def _():
        acc_ref[...] = jnp.zeros_like(acc_ref)

    # Upcast before subtract (matches the reference; free under the HBM bound).
    d = pred_ref[...].astype(jnp.float32) - gt_ref[...].astype(jnp.float32)
    val = jnp.log(jnp.abs(d) + 1.0)                              # VPU + EUP

    if needs_mask:
        # Zero rows past the logical end of the input. The *unclamped* nominal block
        # start is used, so programs whose block index was clamped by the index_map
        # contribute exactly 0 (no double counting), and the undefined contents of a
        # ragged last block never reach the accumulator.
        start = (o * inner + i) * block_rows
        row_ids = start + jax.lax.broadcasted_iota(
            jnp.int32, (block_rows, _LANES), 0)
        val = jnp.where(row_ids < valid_rows, val, 0.0)

    # Fold rows onto 8 sublanes with per-lane adds only (no XLU cross-lane reduce,
    # no narrow masked store in the hot loop).
    partial = val.reshape(block_rows // 8, 8, _LANES).sum(axis=0)   # (8, 128)
    acc_ref[...] += partial[None, :, :]


def depth_grad_loss(depth_grad_pred, depth_grad_gt):
    """Pallas equivalent of DepthGradLoss.forward.

    Args:
      depth_grad_pred: (N, 2, H, W)
      depth_grad_gt:   (N, 2, H, W)
    Returns:
      scalar f32 loss = mean(log(|dx_p-dx_g|+1)) + mean(log(|dy_p-dy_g|+1))
    """
    N, C, H, W = depth_grad_pred.shape
    assert C == 2, "DepthGradLoss expects 2 channels (dx, dy)"
    assert depth_grad_gt.shape == depth_grad_pred.shape

    dtype = depth_grad_pred.dtype
    itemsize = int(jnp.dtype(dtype).itemsize)
    sub = max(8, 32 // itemsize)            # sublane group: f32->8, bf16->16, int8->32

    total = N * C * H * W

    p = depth_grad_pred.reshape(-1)
    g = depth_grad_gt.reshape(-1)

    lane_pad = (-total) % _LANES
    if lane_pad:
        # <=127-element tail; log(|0-0|+1)=0 so padding never affects the sum.
        p = jnp.pad(p, (0, lane_pad))
        g = jnp.pad(g, (0, lane_pad))
    rows = (total + lane_pad) // _LANES
    p2 = p.reshape(rows, _LANES)
    g2 = g.reshape(rows, _LANES)

    if rows < sub:
        # Tiny input: pad rows up to one sublane group (<4 KiB; zeros contribute 0).
        row_pad = sub - rows
        p2 = jnp.pad(p2, ((0, row_pad), (0, 0)))
        g2 = jnp.pad(g2, ((0, row_pad), (0, 0)))
        rows = sub

    target_rows = max(sub, (_TARGET_TILE_BYTES // (_LANES * itemsize)) // sub * sub)
    block_rows = min(target_rows, (rows // sub) * sub)

    outer = _num_tensorcores_per_chip()
    nblocks = _cdiv(rows, block_rows)
    inner = _cdiv(nblocks, outer)
    needs_mask = (rows % block_rows != 0) or (outer * inner != nblocks)

    def in_map(o, i):
        # Clamp so even "overhang" programs DMA a valid block (masked to 0 in-kernel).
        return (jnp.minimum(o * inner + i, nblocks - 1), 0)

    kernel = functools.partial(
        _depth_grad_sum_kernel,
        block_rows=block_rows, inner=inner, valid_rows=rows, needs_mask=needs_mask)

    cost = pl.CostEstimate(
        flops=5 * total,
        transcendentals=total,
        bytes_accessed=2 * total * itemsize + outer * 8 * _LANES * 4,
    )

    partials = pl.pallas_call(
        kernel,
        out_shape=jax.ShapeDtypeStruct((outer, 8, _LANES), jnp.float32),
        grid_spec=pltpu.PrefetchScalarGridSpec(
            num_scalar_prefetch=0,
            grid=(outer, inner),
            in_specs=[
                pl.BlockSpec((block_rows, _LANES), in_map),
                pl.BlockSpec((block_rows, _LANES), in_map),
            ],
            out_specs=pl.BlockSpec((1, 8, _LANES), lambda o, i: (o, 0, 0)),
        ),
        compiler_params=pltpu.CompilerParams(
            dimension_semantics=("parallel", "arbitrary"),
            vmem_limit_bytes=_VMEM_LIMIT_BYTES,
        ),
        cost_estimate=cost,
    )(p2, g2)

    # loss_dx + loss_dy == (global sum) / (N*H*W): both channel means share the divisor.
    return jnp.sum(partials) / jnp.float32(N * H * W)


def _reference(depth_grad_pred, depth_grad_gt):
    # Pure-JAX reference of the PyTorch forward for sanity checking.
    p = depth_grad_pred.astype(jnp.float32)
    g = depth_grad_gt.astype(jnp.float32)
    loss_dx = jnp.mean(jnp.log(jnp.abs(p[:, 0] - g[:, 0]) + 1.0))
    loss_dy = jnp.mean(jnp.log(jnp.abs(p[:, 1] - g[:, 1]) + 1.0))
    return loss_dx + loss_dy


if __name__ == "__main__":
    key = jax.random.PRNGKey(0)
    k1, k2 = jax.random.split(key)

    # Primary small shape (module requires exactly 2 channels: dx, dy).
    N, C, H, W = 2, 2, 16, 16
    depth_grad_pred = jax.random.normal(k1, (N, C, H, W), dtype=jnp.float32)
    depth_grad_gt = jax.random.normal(k2, (N, C, H, W), dtype=jnp.float32)

    loss = jax.block_until_ready(depth_grad_loss(depth_grad_pred, depth_grad_gt))
    ref = _reference(depth_grad_pred, depth_grad_gt)
    assert jnp.allclose(loss, ref, rtol=1e-5, atol=1e-5), (loss, ref)

    # Ragged shape: exercises the <=127-elem tail pad + in-kernel last-block mask.
    k3, k4 = jax.random.split(k1)
    pred2 = jax.random.normal(k3, (2, 2, 17, 24), dtype=jnp.float32)
    gt2 = jax.random.normal(k4, (2, 2, 17, 24), dtype=jnp.float32)
    loss2 = jax.block_until_ready(depth_grad_loss(pred2, gt2))
    ref2 = _reference(pred2, gt2)
    assert jnp.allclose(loss2, ref2, rtol=1e-5, atol=1e-5), (loss2, ref2)

    print("KERNEL_OK")
</pallas_src>

<mosaic_0001>
module attributes {stable_mosaic.version = 11 : i64} {
  func.func @_depth_grad_sum_kernel(%arg0: i32, %arg1: i32, %arg2: memref<8x128xf32, #tpu.memory_space<vmem>>, %arg3: memref<8x128xf32, #tpu.memory_space<vmem>>, %arg4: memref<1x8x128xf32, #tpu.memory_space<vmem>>) attributes {dimension_semantics = [#tpu.dimension_semantics<parallel>, #tpu.dimension_semantics<arbitrary>], iteration_bounds = array<i64: 1, 1>, scalar_prefetch = 0 : i64, scratch_operands = 0 : i64, tpu.core_type = #tpu.core_type<tc>, window_params = [{transform_indices = @transform_0, window_bounds = array<i64: 8, 128>}, {transform_indices = @transform_1, window_bounds = array<i64: 8, 128>}, {transform_indices = @transform_2, window_bounds = array<i64: 1, 8, 128>}]} {
    %c0_i32 = arith.constant 0 : i32
    %0 = arith.cmpi eq, %arg1, %c0_i32 : i32
    %1 = arith.extui %0 : i1 to i32
    %c0_i32_0 = arith.constant 0 : i32
    %2 = arith.cmpi ne, %1, %c0_i32_0 : i32
    scf.if %2 {
      %cst_11 = arith.constant 0.000000e+00 : f32
      %16 = vector.broadcast %cst_11 : f32 to vector<1x8x128xf32>
      %c0_12 = arith.constant 0 : index
      %c0_13 = arith.constant 0 : index
      %c0_14 = arith.constant 0 : index
      %17 = vector.load %arg4[%c0_12, %c0_13, %c0_14] : memref<1x8x128xf32, #tpu.memory_space<vmem>>, vector<1x8x128xf32>
      tpu.vector_store %arg4[%c0_12, %c0_13, %c0_14], %16 {strides = array<i32>} : memref<1x8x128xf32, #tpu.memory_space<vmem>>, vector<1x8x128xf32>,
    } else {
    }
    %c0 = arith.constant 0 : index
    %c0_1 = arith.constant 0 : index
    %3 = vector.load %arg2[%c0, %c0_1] : memref<8x128xf32, #tpu.memory_space<vmem>>, vector<8x128xf32>
    %c0_2 = arith.constant 0 : index
    %c0_3 = arith.constant 0 : index
    %4 = vector.load %arg3[%c0_2, %c0_3] : memref<8x128xf32, #tpu.memory_space<vmem>>, vector<8x128xf32>
    %5 = arith.subf %3, %4 : vector<8x128xf32>
    %6 = math.absf %5 : vector<8x128xf32>
    %cst = arith.constant 1.000000e+00 : f32
    %7 = vector.broadcast %cst : f32 to vector<8x128xf32>
    %8 = arith.addf %6, %7 : vector<8x128xf32>
    %9 = math.log %8 : vector<8x128xf32>
    %10 = vector.shape_cast %9 : vector<8x128xf32> to vector<1x8x128xf32>
    %cst_4 = arith.constant dense<0.000000e+00> : vector<8x128xf32>
    %11 = vector.multi_reduction <add>, %10, %cst_4 [0] : vector<1x8x128xf32> to vector<8x128xf32>
    %c0_5 = arith.constant 0 : index
    %c0_6 = arith.constant 0 : index
    %c0_7 = arith.constant 0 : index
    %12 = vector.load %arg4[%c0_5, %c0_6, %c0_7] : memref<1x8x128xf32, #tpu.memory_space<vmem>>, vector<1x8x128xf32>
    %13 = vector.shape_cast %11 : vector<8x128xf32> to vector<1x8x128xf32>
    %14 = arith.addf %12, %13 : vector<1x8x128xf32>
    %c0_8 = arith.constant 0 : index
    %c0_9 = arith.constant 0 : index
    %c0_10 = arith.constant 0 : index
    %15 = vector.load %arg4[%c0_8, %c0_9, %c0_10] : memref<1x8x128xf32, #tpu.memory_space<vmem>>, vector<1x8x128xf32>
    tpu.vector_store %arg4[%c0_8, %c0_9, %c0_10], %14 {strides = array<i32>} : memref<1x8x128xf32, #tpu.memory_space<vmem>>, vector<1x8x128xf32>,
    return
  }
  func.func @transform_0(%arg0: i32, %arg1: i32) -> (i32, i32) {
    %c1_i32 = arith.constant 1 : i32
    %0 = arith.muli %arg0, %c1_i32 : i32
    %1 = arith.addi %0, %arg1 : i32
    %c0_i32 = arith.constant 0 : i32
    %2 = arith.minsi %1, %c0_i32 : i32
    %c0_i32_0 = arith.constant 0 : i32
    %c0_i32_1 = arith.constant 0 : i32
    return %2, %c0_i32_0 : i32, i32
  }
  func.func @transform_1(%arg0: i32, %arg1: i32) -> (i32, i32) {
    %c1_i32 = arith.constant 1 : i32
    %0 = arith.muli %arg0, %c1_i32 : i32
    %1 = arith.addi %0, %arg1 : i32
    %c0_i32 = arith.constant 0 : i32
    %2 = arith.minsi %1, %c0_i32 : i32
    %c0_i32_0 = arith.constant 0 : i32
    %c0_i32_1 = arith.constant 0 : i32
    return %2, %c0_i32_0 : i32, i32
  }
  func.func @transform_2(%arg0: i32, %arg1: i32) -> (i32, i32, i32) {
    %c0_i32 = arith.constant 0 : i32
    %c0_i32_0 = arith.constant 0 : i32
    %c0_i32_1 = arith.constant 0 : i32
    return %arg0, %c0_i32, %c0_i32_0 : i32, i32, i32
  }
}

</mosaic_0001>

<bundles_post_ra>
// kernel: tpu_custom_call.1
= control target key start
LH: loop header
LB: loop body
LE: loop exit
PB: predicated region body
PF: predicated region fallthrough
CT: control target
= control target key end

     0   :  { %7 = vsyncpa [#allocation3], 0  ;;  %s220_s0 = inlined_call_operand.hbm [shape: f32[8,128], index: 0, kind: input, shape index: {}]   ;;  %s221_s1 = inlined_call_operand.hbm [shape: f32[8,128], index: 1, kind: input, shape index: {}]   ;;  %s222_s2 = inlined_call_operand.hbm [shape: f32[1,8,128], index: 2, kind: output, shape index: {}]  }
   0x1   :  { %8 = vsyncpa [#allocation6], 0 }
   0x2   :  { %9 = vsyncpa [#allocation4], 0  ;;  %s166_s9 = smov [#allocation2]   ;;  %s167_s11 = smov [#allocation5]  }
   0x3   :  { %s21_s10 = sshll.u32 %s166_s9, 4  ;;  %s36_s12 = sshll.u32 %s167_s11, 4  ;;  %s22_s10 = int_to_ptr.vmem [resolvable:$true] %s21_s10  ;;  %s37_s12 = int_to_ptr.vmem [resolvable:$true] %s36_s12 }
   0x4   :  { %s94_s15 = scalar_lea.hbm %s220_s0, 128 }
   0x5   :  { %p95_p0 = scmp.ne.s32.totalorder %s220_s0, %s94_s15  ;;  %p98_p1 = scmp.lt.u32.totalorder %s94_s15, %s220_s0 }
   0x7   :  { %p100_p2 = pnand %p98_p1, %p95_p0 }
   0x9   :  { %103 = shalt.err (!%p100_p2)
}
   0xa   :  { %s104_s20 = scalar_lea.vmem %s22_s10, 128  ;;  %p109_p4 = scmp.lt.s32.totalorder %s22_s10, %s22_s10 }
   0xb   :  { %p105_p3 = scmp.ne.s32.totalorder %s22_s10, %s104_s20  ;;  %p110_p5 = scmp.lt.s32.totalorder %s104_s20, %s104_s20 }
   0xd   :  { %p111_p6 = por %p110_p5, %p109_p4 }
   0xf   :  { %p112_p7 = pnand %p111_p6, %p105_p3 }
  0x11   :  { %115 = shalt.err (!%p112_p7)
}
  0x12   :  { %24 = dma.hbm_to_vmem [thread:$0]  %s220_s0, 128, %s22_s10, [#allocation3]  }
  0x13   :  { %s116_s25 = scalar_lea.hbm %s221_s1, 128 }
  0x14   :  { %p117_p8 = scmp.ne.s32.totalorder %s221_s1, %s116_s25  ;;  %p120_p9 = scmp.lt.u32.totalorder %s116_s25, %s221_s1 }
  0x16   :  { %p122_p10 = pnand %p120_p9, %p117_p8 }
  0x18   :  { %125 = shalt.err (!%p122_p10)
}
  0x19   :  { %s126_s30 = scalar_lea.vmem %s37_s12, 128  ;;  %p131_p12 = scmp.lt.s32.totalorder %s37_s12, %s37_s12 }
  0x1a   :  { %p127_p11 = scmp.ne.s32.totalorder %s37_s12, %s126_s30  ;;  %p132_p13 = scmp.lt.s32.totalorder %s126_s30, %s126_s30 }
  0x1c   :  { %p133_p0 = por %p132_p13, %p131_p12 }
  0x1e   :  { %p134_p1 = pnand %p133_p0, %p127_p11 }
  0x20   :  { %137 = shalt.err (!%p134_p1)
}
  0x21   :  { %39 = dma.hbm_to_vmem [thread:$0]  %s221_s1, 128, %s37_s12, [#allocation6]  }
  0x22   :  { %160 = dma.done.wait [#allocation3], 128  }
  0x23   :  { %161 = vsyncadd [#allocation3], 4294967168 }
  0x24   :  { %162 = dma.done.wait [#allocation6], 128  }
  0x25   :  { %163 = vsyncadd [#allocation6], 4294967168  ;;  %v57_v0 = vld [vmem:[#allocation2] sm:$0xff]  ;;  %v58_v1 = vld [vmem:[#allocation5] sm:$0xff]  ;;  %s168_s4 = smov [#allocation7]  }
  0x26   :  { %v59_v2 = vsub.f32 %v57_v0, %v58_v1  ;;  %s74_s5 = sshll.u32 %s168_s4, 4  ;;  %s75_s5 = int_to_ptr.vmem [resolvable:$true] %s74_s5 }
  0x27   :  { %s138_s6 = scalar_lea.vmem %s75_s5, 128  ;;  %p143_p3 = scmp.lt.s32.totalorder %s75_s5, %s75_s5 }
  0x28   :  { %v60_v3 = vand.u32 2147483647, %v59_v2  ;;  %p139_p2 = scmp.ne.s32.totalorder %s75_s5, %s138_s6  ;;  %p144_p4 = scmp.lt.s32.totalorder %s138_s6, %s138_s6 }
  0x2a   :  { %v61_v4 = vadd.f32 1.0, %v60_v3  ;;  %p145_p5 = por %p144_p4, %p143_p3 }
  0x2c   :  { %92 = vlog2.f32 %v61_v4  ;;  %p146_p6 = pnand %p145_p5, %p139_p2 }
  0x36   :  { %v93_v5 = vpop.eup %92 }
  0x37   :  { %v63_v6 = vmul.f32 0.6931472, %v93_v5 }
  0x39   :  { %67 = vst [vmem:[#allocation7] sm:$0xff] %v63_v6 }
  0x3a   :  { %149 = shalt.err (!%p146_p6)
}
  0x3b   :  { %s150_s8 = scalar_lea.hbm %s222_s2, 128 }
  0x3c   :  { %p151_p7 = scmp.ne.s32.totalorder %s222_s2, %s150_s8  ;;  %p154_p8 = scmp.lt.u32.totalorder %s150_s8, %s222_s2 }
  0x3e   :  { %p156_p9 = pnand %p154_p8, %p151_p7 }
  0x40   :  { %159 = shalt.err (!%p156_p9)
}
  0x41   :  { %77 = dma.vmem_to_hbm [thread:$0]  %s75_s5, 128, %s222_s2, [#allocation4]  }
  0x42   :  { %164 = dma.done.wait [#allocation4], 128  }
  0x43   :  { %165 = vsyncadd [#allocation4], 4294967168 }
  0x44   :  { %81 = vsyncpa [#allocation3], 1 }
  0x45   :  { %82 = vsyncpa [#allocation6], 1 }
  0x46   :  { %83 = vsyncpa [#allocation4], 1 }

</bundles_post_ra>
